<compile_context>
chip_gen: v7x
topology: tpu7x:2x2x1
jax: 0.10.0
libtpu: 0.0.40
codegen_flags: <defaults>
</compile_context>

<pallas_src>
import functools
import math

import jax
import jax.numpy as jnp
from jax.experimental import pallas as pl
from jax.experimental.pallas import tpu as pltpu

# Module geometry (from the PyTorch spec).
CIN1, COUT1, K1, S1, PAD1 = 26, 13, 5, 2, 1   # conv1, groups=13 -> 2 in-ch/group
CIN2, COUT2, K2 = 6, 3, 2                     # conv2, groups=3  -> 2 in-ch/group
GA = (K1 + S1 - 1) // S1                      # 3: tap groups per spatial dim
NLANE = 128                                   # lane-dense weight/output width

_GELU_C0 = 0.7978845608028654
_GELU_C1 = 0.044715


# ---------------------------- the fused kernel ----------------------------

def _fused_conv_gelu_kernel(slab_ref, w1g_ref, b1_ref, w2_ref, b2_ref, o_ref,
                            *, H1p, W1p, M1, M2):
    cdt = w1g_ref.dtype                       # bf16 matmul operand dtype
    kin = slab_ref.shape[-1]                  # 4*CIN1 = 104

    # Load the bf16 slab once (aligned, lane-dense DMA) and upcast; all the
    # overlapping-window slicing / (H1p,W1p,104)->(M1,104) reshapes then
    # happen on an f32 value (avoids odd sublane offsets on packed bf16).
    slab = slab_ref[...].astype(jnp.float32)

    # ---- conv1 (5x5, stride 2, groups=13): 9 grouped-tap matmuls, K=104 ----
    acc1 = jnp.zeros((M1, NLANE), jnp.float32)    # 8 vregs, register-resident
    for a in range(GA):
        for b in range(GA):
            lhs = slab[a:a + H1p, b:b + W1p, :].reshape(M1, kin).astype(cdt)
            acc1 = acc1 + jnp.dot(lhs, w1g_ref[a * GA + b],
                                  preferred_element_type=jnp.float32)
    v1 = acc1 + b1_ref[...]                   # (M1, 128) f32; lanes >= 13 are 0

    # ---- conv2 (2x2, stride 1, groups=3) fused into ONE matmul ----
    # The 4 taps are contiguous row shifts of the flat conv1 grid; concat them
    # along lanes (K = 4*128) so the accumulation happens inside the MXU.
    # TODO(synk): the original PyTorch module is internally inconsistent
    # (conv1 outputs 13 channels, conv2 expects 6) and its forward raises; as
    # before conv2 consumes the first 6 channels (w2 rows >= 6 are zero).
    parts = [v1[ky * W1p + kx:ky * W1p + kx + M2, :].astype(cdt)
             for ky in range(K2) for kx in range(K2)]
    lhs2 = jnp.concatenate(parts, axis=1)     # (M2, 512) bf16
    v2 = jnp.dot(lhs2, w2_ref[...], preferred_element_type=jnp.float32)
    v2 = v2 + b2_ref[...]

    # Approximate-tanh GELU tail (tanh on the EUP slot; extra lanes are free).
    o_ref[...] = 0.5 * v2 * (1.0 + jnp.tanh(_GELU_C0 * (v2 + _GELU_C1 * (v2 * v2) * v2)))


# ----------------- init-time weight layout (hoisted out of fwd) -----------------

def prepare_params(w1, b1, w2, b2, matmul_dtype=jnp.bfloat16):
    """Build lane-padded grouped weight slabs once, at init time.

    w1g[oh*3+ow, (py*2+px)*26 + c, o] = w1[o, c-2o, 2*oh+py, 2*ow+px]
                                        (valid taps only, else 0)
    w2cat[(ky*2+kx)*128 + c, o]       = w2[o, c-2o, ky, kx]  (else 0)
    """
    w1 = jnp.asarray(w1, jnp.float32); b1 = jnp.asarray(b1, jnp.float32)
    w2 = jnp.asarray(w2, jnp.float32); b2 = jnp.asarray(b2, jnp.float32)

    # Per-tap block-diagonal slabs: w1t[ky*5+kx, 2o+cg, o] = w1[o, cg, ky, kx].
    w1t = jnp.zeros((K1 * K1, CIN1, NLANE), jnp.float32)
    for o in range(COUT1):
        blk = jnp.transpose(w1[o], (1, 2, 0)).reshape(K1 * K1, 2)
        w1t = w1t.at[:, 2 * o:2 * o + 2, o].set(blk)

    # Group the 25 taps by (oh, ow) = (ky//2, kx//2); the 4 stride-2 phases
    # interleave along K.  Missing taps (oh==2 or ow==2 partial groups) stay 0.
    w1g = jnp.zeros((GA * GA, 4 * CIN1, NLANE), jnp.float32)
    for ky in range(K1):
        for kx in range(K1):
            a, py = divmod(ky, S1)
            b, px = divmod(kx, S1)
            p = py * 2 + px
            w1g = w1g.at[a * GA + b, p * CIN1:(p + 1) * CIN1, :].set(
                w1t[ky * K1 + kx])

    # conv2: 4 taps stacked along K (row block t = ky*2+kx of 128 rows).
    w2t = jnp.zeros((K2 * K2, NLANE, NLANE), jnp.float32)
    for o in range(COUT2):
        blk = jnp.transpose(w2[o], (1, 2, 0)).reshape(K2 * K2, 2)
        w2t = w2t.at[:, 2 * o:2 * o + 2, o].set(blk)
    w2cat = w2t.reshape(K2 * K2 * NLANE, NLANE)

    b1p = jnp.zeros((1, NLANE), jnp.float32).at[0, :COUT1].set(b1)
    b2p = jnp.zeros((1, NLANE), jnp.float32).at[0, :COUT2].set(b2)
    return dict(w1g=w1g.astype(matmul_dtype), b1p=b1p,
                w2cat=w2cat.astype(matmul_dtype), b2p=b2p)


# ---------------------------- model forward ----------------------------

def model_forward(x, prep):
    """x: (1, 26, H, W) float32 NCHW  ->  (1, 3, H2, W2) float32."""
    w1g, b1p, w2cat, b2p = prep["w1g"], prep["b1p"], prep["w2cat"], prep["b2p"]
    n, c, H, W = x.shape
    assert n == 1 and c == CIN1, (n, c)

    H1 = (H + 2 * PAD1 - K1) // S1 + 1
    W1 = (W + 2 * PAD1 - K1) // S1 + 1
    H2, W2 = H1 - K2 + 1, W1 - K2 + 1
    # conv1 is evaluated on an extended (H1p, W1p) grid so that row counts are
    # sublane friendly (64 / 48 for the 16x16 demo) and conv2's 2x2 im2col is
    # a contiguous row shift of the flat grid.  Geometry validated at 16x16.
    H1p, W1p = H1 + 1, W1 + 1
    Hs, Ws = H1p + 2, W1p + 2                 # slab extent for the 3x3 groups
    Hpad, Wpad = 2 * Hs, 2 * Ws
    M1, M2 = H1p * W1p, H2 * W1p

    # Single bf16 phase-interleaved slab (half the HBM bytes of the old f32
    # phase stack, one fused pad/relayout pass):
    #   slab[i, j, (py*2+px)*26 + c] = xpad[c, 2i+py, 2j+px]
    x0 = x[0].astype(jnp.bfloat16)
    xp = jnp.pad(x0, ((0, 0), (PAD1, Hpad - H - PAD1), (PAD1, Wpad - W - PAD1)))
    slab = xp.reshape(CIN1, Hs, 2, Ws, 2)
    slab = jnp.transpose(slab, (1, 3, 2, 4, 0)).reshape(Hs, Ws, 4 * CIN1)

    kernel = functools.partial(_fused_conv_gelu_kernel,
                               H1p=H1p, W1p=W1p, M1=M1, M2=M2)
    out = pl.pallas_call(
        kernel,
        out_shape=jax.ShapeDtypeStruct((M2, NLANE), jnp.float32),
        in_specs=[pl.BlockSpec(memory_space=pltpu.MemorySpace.VMEM)
                  for _ in range(5)],
        out_specs=pl.BlockSpec(memory_space=pltpu.MemorySpace.VMEM),
    )(slab, w1g, b1p, w2cat, b2p)

    v11 = out.reshape(H2, W1p, NLANE)[:, :W2, :COUT2]   # drop padded rows/lanes
    return jnp.transpose(v11, (2, 0, 1))[None]          # (1, 3, H2, W2) NCHW


# ---------------------------- plain-JAX reference ----------------------------

def _reference(x, w1, b1, w2, b2):
    v1 = jax.lax.conv_general_dilated(
        x, w1, window_strides=(S1, S1), padding=((PAD1, PAD1), (PAD1, PAD1)),
        dimension_numbers=("NCHW", "OIHW", "NCHW"), feature_group_count=COUT1)
    v1 = v1 + b1[None, :, None, None]
    v2 = jax.lax.conv_general_dilated(
        v1[:, :CIN2], w2, window_strides=(1, 1), padding=((0, 0), (0, 0)),
        dimension_numbers=("NCHW", "OIHW", "NCHW"), feature_group_count=COUT2)
    v2 = v2 + b2[None, :, None, None]
    return 0.5 * v2 * (1.0 + jnp.tanh(_GELU_C0 * (v2 + _GELU_C1 * v2 ** 3)))


if __name__ == "__main__":
    key = jax.random.PRNGKey(0)
    k1, k2, k3, k4, k5 = jax.random.split(key, 5)

    # Small shapes consistent with the module: N=1, C_in=26 (required by
    # conv1), 16x16 spatial instead of 112x112.
    x = jax.random.normal(k1, (1, CIN1, 16, 16), jnp.float32)

    # Deterministic PyTorch Conv2d-style uniform init.
    bound1 = 1.0 / math.sqrt(2 * K1 * K1)
    w1 = jax.random.uniform(k2, (COUT1, 2, K1, K1), jnp.float32, -bound1, bound1)
    b1 = jax.random.uniform(k3, (COUT1,), jnp.float32, -bound1, bound1)
    bound2 = 1.0 / math.sqrt(2 * K2 * K2)
    w2 = jax.random.uniform(k4, (COUT2, 2, K2, K2), jnp.float32, -bound2, bound2)
    b2 = jax.random.uniform(k5, (COUT2,), jnp.float32, -bound2, bound2)

    prep = prepare_params(w1, b1, w2, b2)     # init-time only (hoisted)
    fwd = jax.jit(model_forward)
    out = fwd(x, prep)
    jax.block_until_ready(out)
    assert out.shape == (1, COUT2, 6, 6), out.shape

    # Sanity check vs the plain-JAX reference (loose tol: bf16 matmul operands).
    ref = _reference(x, w1, b1, w2, b2)
    assert float(jnp.max(jnp.abs(out - ref))) < 5e-2

    print("KERNEL_OK")
</pallas_src>

<mosaic_0001>
module attributes {stable_mosaic.version = 11 : i64} {
  func.func @_fused_conv_gelu_kernel(%arg0: memref<10x10x104xbf16, #tpu.memory_space<vmem>>, %arg1: memref<9x104x128xbf16, #tpu.memory_space<vmem>>, %arg2: memref<1x128xf32, #tpu.memory_space<vmem>>, %arg3: memref<512x128xbf16, #tpu.memory_space<vmem>>, %arg4: memref<1x128xf32, #tpu.memory_space<vmem>>, %arg5: memref<48x128xf32, #tpu.memory_space<vmem>>) attributes {dimension_semantics = [], scalar_prefetch = 0 : i64, scratch_operands = 0 : i64, tpu.core_type = #tpu.core_type<tc>} {
    %c0 = arith.constant 0 : index
    %c0_0 = arith.constant 0 : index
    %c0_1 = arith.constant 0 : index
    %0 = vector.load %arg0[%c0, %c0_0, %c0_1] : memref<10x10x104xbf16, #tpu.memory_space<vmem>>, vector<10x10x104xbf16>
    %1 = arith.extf %0 : vector<10x10x104xbf16> to vector<10x10x104xf32>
    %cst = arith.constant 0.000000e+00 : f32
    %2 = vector.broadcast %cst : f32 to vector<64x128xf32>
    %3 = vector.extract_strided_slice %1 {offsets = [0, 0, 0], sizes = [8, 8, 104], strides = [1, 1, 1]} : vector<10x10x104xf32> to vector<8x8x104xf32>
    %4 = vector.shape_cast %3 : vector<8x8x104xf32> to vector<64x104xf32>
    %5 = arith.truncf %4 : vector<64x104xf32> to vector<64x104xbf16>
    %c0_2 = arith.constant 0 : index
    %c0_3 = arith.constant 0 : index
    %c0_4 = arith.constant 0 : index
    %6 = vector.load %arg1[%c0_2, %c0_3, %c0_4] : memref<9x104x128xbf16, #tpu.memory_space<vmem>>, vector<1x104x128xbf16>
    %7 = vector.shape_cast %6 : vector<1x104x128xbf16> to vector<104x128xbf16>
    %cst_5 = arith.constant dense<0.000000e+00> : vector<64x128xf32>
    %8 = tpu.matmul %5, %7, %cst_5 {dimension_numbers = #tpu.dot_dimension_numbers<[1], [0], [0], [1], [0, 0, 1, 1], [], []>} : vector<64x104xbf16>, vector<104x128xbf16>, vector<64x128xf32> -> vector<64x128xf32>
    %9 = arith.addf %2, %8 : vector<64x128xf32>
    %10 = vector.extract_strided_slice %1 {offsets = [0, 1, 0], sizes = [8, 8, 104], strides = [1, 1, 1]} : vector<10x10x104xf32> to vector<8x8x104xf32>
    %11 = vector.shape_cast %10 : vector<8x8x104xf32> to vector<64x104xf32>
    %12 = arith.truncf %11 : vector<64x104xf32> to vector<64x104xbf16>
    %c1 = arith.constant 1 : index
    %c0_6 = arith.constant 0 : index
    %c0_7 = arith.constant 0 : index
    %13 = vector.load %arg1[%c1, %c0_6, %c0_7] : memref<9x104x128xbf16, #tpu.memory_space<vmem>>, vector<1x104x128xbf16>
    %14 = vector.shape_cast %13 : vector<1x104x128xbf16> to vector<104x128xbf16>
    %cst_8 = arith.constant dense<0.000000e+00> : vector<64x128xf32>
    %15 = tpu.matmul %12, %14, %cst_8 {dimension_numbers = #tpu.dot_dimension_numbers<[1], [0], [0], [1], [0, 0, 1, 1], [], []>} : vector<64x104xbf16>, vector<104x128xbf16>, vector<64x128xf32> -> vector<64x128xf32>
    %16 = arith.addf %9, %15 : vector<64x128xf32>
    %17 = vector.extract_strided_slice %1 {offsets = [0, 2, 0], sizes = [8, 8, 104], strides = [1, 1, 1]} : vector<10x10x104xf32> to vector<8x8x104xf32>
    %18 = vector.shape_cast %17 : vector<8x8x104xf32> to vector<64x104xf32>
    %19 = arith.truncf %18 : vector<64x104xf32> to vector<64x104xbf16>
    %c2 = arith.constant 2 : index
    %c0_9 = arith.constant 0 : index
    %c0_10 = arith.constant 0 : index
    %20 = vector.load %arg1[%c2, %c0_9, %c0_10] : memref<9x104x128xbf16, #tpu.memory_space<vmem>>, vector<1x104x128xbf16>
    %21 = vector.shape_cast %20 : vector<1x104x128xbf16> to vector<104x128xbf16>
    %cst_11 = arith.constant dense<0.000000e+00> : vector<64x128xf32>
    %22 = tpu.matmul %19, %21, %cst_11 {dimension_numbers = #tpu.dot_dimension_numbers<[1], [0], [0], [1], [0, 0, 1, 1], [], []>} : vector<64x104xbf16>, vector<104x128xbf16>, vector<64x128xf32> -> vector<64x128xf32>
    %23 = arith.addf %16, %22 : vector<64x128xf32>
    %24 = vector.extract_strided_slice %1 {offsets = [1, 0, 0], sizes = [8, 8, 104], strides = [1, 1, 1]} : vector<10x10x104xf32> to vector<8x8x104xf32>
    %25 = vector.shape_cast %24 : vector<8x8x104xf32> to vector<64x104xf32>
    %26 = arith.truncf %25 : vector<64x104xf32> to vector<64x104xbf16>
    %c3 = arith.constant 3 : index
    %c0_12 = arith.constant 0 : index
    %c0_13 = arith.constant 0 : index
    %27 = vector.load %arg1[%c3, %c0_12, %c0_13] : memref<9x104x128xbf16, #tpu.memory_space<vmem>>, vector<1x104x128xbf16>
    %28 = vector.shape_cast %27 : vector<1x104x128xbf16> to vector<104x128xbf16>
    %cst_14 = arith.constant dense<0.000000e+00> : vector<64x128xf32>
    %29 = tpu.matmul %26, %28, %cst_14 {dimension_numbers = #tpu.dot_dimension_numbers<[1], [0], [0], [1], [0, 0, 1, 1], [], []>} : vector<64x104xbf16>, vector<104x128xbf16>, vector<64x128xf32> -> vector<64x128xf32>
    %30 = arith.addf %23, %29 : vector<64x128xf32>
    %31 = vector.extract_strided_slice %1 {offsets = [1, 1, 0], sizes = [8, 8, 104], strides = [1, 1, 1]} : vector<10x10x104xf32> to vector<8x8x104xf32>
    %32 = vector.shape_cast %31 : vector<8x8x104xf32> to vector<64x104xf32>
    %33 = arith.truncf %32 : vector<64x104xf32> to vector<64x104xbf16>
    %c4 = arith.constant 4 : index
    %c0_15 = arith.constant 0 : index
    %c0_16 = arith.constant 0 : index
    %34 = vector.load %arg1[%c4, %c0_15, %c0_16] : memref<9x104x128xbf16, #tpu.memory_space<vmem>>, vector<1x104x128xbf16>
    %35 = vector.shape_cast %34 : vector<1x104x128xbf16> to vector<104x128xbf16>
    %cst_17 = arith.constant dense<0.000000e+00> : vector<64x128xf32>
    %36 = tpu.matmul %33, %35, %cst_17 {dimension_numbers = #tpu.dot_dimension_numbers<[1], [0], [0], [1], [0, 0, 1, 1], [], []>} : vector<64x104xbf16>, vector<104x128xbf16>, vector<64x128xf32> -> vector<64x128xf32>
    %37 = arith.addf %30, %36 : vector<64x128xf32>
    %38 = vector.extract_strided_slice %1 {offsets = [1, 2, 0], sizes = [8, 8, 104], strides = [1, 1, 1]} : vector<10x10x104xf32> to vector<8x8x104xf32>
    %39 = vector.shape_cast %38 : vector<8x8x104xf32> to vector<64x104xf32>
    %40 = arith.truncf %39 : vector<64x104xf32> to vector<64x104xbf16>
    %c5 = arith.constant 5 : index
    %c0_18 = arith.constant 0 : index
    %c0_19 = arith.constant 0 : index
    %41 = vector.load %arg1[%c5, %c0_18, %c0_19] : memref<9x104x128xbf16, #tpu.memory_space<vmem>>, vector<1x104x128xbf16>
    %42 = vector.shape_cast %41 : vector<1x104x128xbf16> to vector<104x128xbf16>
    %cst_20 = arith.constant dense<0.000000e+00> : vector<64x128xf32>
    %43 = tpu.matmul %40, %42, %cst_20 {dimension_numbers = #tpu.dot_dimension_numbers<[1], [0], [0], [1], [0, 0, 1, 1], [], []>} : vector<64x104xbf16>, vector<104x128xbf16>, vector<64x128xf32> -> vector<64x128xf32>
    %44 = arith.addf %37, %43 : vector<64x128xf32>
    %45 = vector.extract_strided_slice %1 {offsets = [2, 0, 0], sizes = [8, 8, 104], strides = [1, 1, 1]} : vector<10x10x104xf32> to vector<8x8x104xf32>
    %46 = vector.shape_cast %45 : vector<8x8x104xf32> to vector<64x104xf32>
    %47 = arith.truncf %46 : vector<64x104xf32> to vector<64x104xbf16>
    %c6 = arith.constant 6 : index
    %c0_21 = arith.constant 0 : index
    %c0_22 = arith.constant 0 : index
    %48 = vector.load %arg1[%c6, %c0_21, %c0_22] : memref<9x104x128xbf16, #tpu.memory_space<vmem>>, vector<1x104x128xbf16>
    %49 = vector.shape_cast %48 : vector<1x104x128xbf16> to vector<104x128xbf16>
    %cst_23 = arith.constant dense<0.000000e+00> : vector<64x128xf32>
    %50 = tpu.matmul %47, %49, %cst_23 {dimension_numbers = #tpu.dot_dimension_numbers<[1], [0], [0], [1], [0, 0, 1, 1], [], []>} : vector<64x104xbf16>, vector<104x128xbf16>, vector<64x128xf32> -> vector<64x128xf32>
    %51 = arith.addf %44, %50 : vector<64x128xf32>
    %52 = vector.extract_strided_slice %1 {offsets = [2, 1, 0], sizes = [8, 8, 104], strides = [1, 1, 1]} : vector<10x10x104xf32> to vector<8x8x104xf32>
    %53 = vector.shape_cast %52 : vector<8x8x104xf32> to vector<64x104xf32>
    %54 = arith.truncf %53 : vector<64x104xf32> to vector<64x104xbf16>
    %c7 = arith.constant 7 : index
    %c0_24 = arith.constant 0 : index
    %c0_25 = arith.constant 0 : index
    %55 = vector.load %arg1[%c7, %c0_24, %c0_25] : memref<9x104x128xbf16, #tpu.memory_space<vmem>>, vector<1x104x128xbf16>
    %56 = vector.shape_cast %55 : vector<1x104x128xbf16> to vector<104x128xbf16>
    %cst_26 = arith.constant dense<0.000000e+00> : vector<64x128xf32>
    %57 = tpu.matmul %54, %56, %cst_26 {dimension_numbers = #tpu.dot_dimension_numbers<[1], [0], [0], [1], [0, 0, 1, 1], [], []>} : vector<64x104xbf16>, vector<104x128xbf16>, vector<64x128xf32> -> vector<64x128xf32>
    %58 = arith.addf %51, %57 : vector<64x128xf32>
    %59 = vector.extract_strided_slice %1 {offsets = [2, 2, 0], sizes = [8, 8, 104], strides = [1, 1, 1]} : vector<10x10x104xf32> to vector<8x8x104xf32>
    %60 = vector.shape_cast %59 : vector<8x8x104xf32> to vector<64x104xf32>
    %61 = arith.truncf %60 : vector<64x104xf32> to vector<64x104xbf16>
    %c8 = arith.constant 8 : index
    %c0_27 = arith.constant 0 : index
    %c0_28 = arith.constant 0 : index
    %62 = vector.load %arg1[%c8, %c0_27, %c0_28] : memref<9x104x128xbf16, #tpu.memory_space<vmem>>, vector<1x104x128xbf16>
    %63 = vector.shape_cast %62 : vector<1x104x128xbf16> to vector<104x128xbf16>
    %cst_29 = arith.constant dense<0.000000e+00> : vector<64x128xf32>
    %64 = tpu.matmul %61, %63, %cst_29 {dimension_numbers = #tpu.dot_dimension_numbers<[1], [0], [0], [1], [0, 0, 1, 1], [], []>} : vector<64x104xbf16>, vector<104x128xbf16>, vector<64x128xf32> -> vector<64x128xf32>
    %65 = arith.addf %58, %64 : vector<64x128xf32>
    %c0_30 = arith.constant 0 : index
    %c0_31 = arith.constant 0 : index
    %66 = vector.load %arg2[%c0_30, %c0_31] : memref<1x128xf32, #tpu.memory_space<vmem>>, vector<1x128xf32>
    %67 = vector.broadcast %66 : vector<1x128xf32> to vector<64x128xf32>
    %68 = arith.addf %65, %67 : vector<64x128xf32>
    %69 = vector.extract_strided_slice %68 {offsets = [0, 0], sizes = [48, 128], strides = [1, 1]} : vector<64x128xf32> to vector<48x128xf32>
    %70 = arith.truncf %69 : vector<48x128xf32> to vector<48x128xbf16>
    %71 = vector.extract_strided_slice %68 {offsets = [1, 0], sizes = [48, 128], strides = [1, 1]} : vector<64x128xf32> to vector<48x128xf32>
    %72 = arith.truncf %71 : vector<48x128xf32> to vector<48x128xbf16>
    %73 = vector.extract_strided_slice %68 {offsets = [8, 0], sizes = [48, 128], strides = [1, 1]} : vector<64x128xf32> to vector<48x128xf32>
    %74 = arith.truncf %73 : vector<48x128xf32> to vector<48x128xbf16>
    %75 = vector.extract_strided_slice %68 {offsets = [9, 0], sizes = [48, 128], strides = [1, 1]} : vector<64x128xf32> to vector<48x128xf32>
    %76 = arith.truncf %75 : vector<48x128xf32> to vector<48x128xbf16>
    %77 = tpu.concatenate %70, %72, %74, %76 in 1 : vector<48x128xbf16>, vector<48x128xbf16>, vector<48x128xbf16>, vector<48x128xbf16> -> vector<48x512xbf16>
    %c0_32 = arith.constant 0 : index
    %c0_33 = arith.constant 0 : index
    %78 = vector.load %arg3[%c0_32, %c0_33] : memref<512x128xbf16, #tpu.memory_space<vmem>>, vector<512x128xbf16>
    %cst_34 = arith.constant dense<0.000000e+00> : vector<48x128xf32>
    %79 = tpu.matmul %77, %78, %cst_34 {dimension_numbers = #tpu.dot_dimension_numbers<[1], [0], [0], [1], [0, 0, 1, 1], [], []>} : vector<48x512xbf16>, vector<512x128xbf16>, vector<48x128xf32> -> vector<48x128xf32>
    %c0_35 = arith.constant 0 : index
    %c0_36 = arith.constant 0 : index
    %80 = vector.load %arg4[%c0_35, %c0_36] : memref<1x128xf32, #tpu.memory_space<vmem>>, vector<1x128xf32>
    %81 = vector.broadcast %80 : vector<1x128xf32> to vector<48x128xf32>
    %82 = arith.addf %79, %81 : vector<48x128xf32>
    %cst_37 = arith.constant 5.000000e-01 : f32
    %83 = vector.broadcast %cst_37 : f32 to vector<48x128xf32>
    %84 = arith.mulf %83, %82 : vector<48x128xf32>
    %85 = arith.mulf %82, %82 : vector<48x128xf32>
    %cst_38 = arith.constant 4.471500e-02 : f32
    %86 = vector.broadcast %cst_38 : f32 to vector<48x128xf32>
    %87 = arith.mulf %86, %85 : vector<48x128xf32>
    %88 = arith.mulf %87, %82 : vector<48x128xf32>
    %89 = arith.addf %82, %88 : vector<48x128xf32>
    %cst_39 = arith.constant 0.797884583 : f32
    %90 = vector.broadcast %cst_39 : f32 to vector<48x128xf32>
    %91 = arith.mulf %90, %89 : vector<48x128xf32>
    %92 = math.tanh %91 : vector<48x128xf32>
    %cst_40 = arith.constant 1.000000e+00 : f32
    %93 = vector.broadcast %cst_40 : f32 to vector<48x128xf32>
    %94 = arith.addf %93, %92 : vector<48x128xf32>
    %95 = arith.mulf %84, %94 : vector<48x128xf32>
    %c0_41 = arith.constant 0 : index
    %c0_42 = arith.constant 0 : index
    %96 = vector.load %arg5[%c0_41, %c0_42] : memref<48x128xf32, #tpu.memory_space<vmem>>, vector<48x128xf32>
    tpu.vector_store %arg5[%c0_41, %c0_42], %95 {strides = array<i32>} : memref<48x128xf32, #tpu.memory_space<vmem>>, vector<48x128xf32>,
    return
  }
}

</mosaic_0001>

<bundles_post_ra>
// kernel: model_forward.1
= control target key start
LH: loop header
LB: loop body
LE: loop exit
PB: predicated region body
PF: predicated region fallthrough
CT: control target
= control target key end

     0   :  { %vm184_vm0 = vcmask 850944   ;;  %vm197_vm1 = vcmask 1043456   ;;  %vm94_vm2 = vcmask 1046528   ;;  %vm385_vm3 = vcmask 1045504   ;;  %s3450_s1 = inlined_call_operand.vmem [shape: bf16[9,104,128], index: 1, kind: input, shape index: {}]   ;;  %s3451_s0 = inlined_call_operand.vmem [shape: bf16[10,10,104], index: 0, kind: input, shape index: {}]   ;;  %s3452_s3 = inlined_call_operand.vmem [shape: bf16[512,128], index: 3, kind: input, shape index: {}]   ;;  %s3453_s2 = inlined_call_operand.vmem [shape: f32[1,128], index: 2, kind: input, shape index: {}]   ;;  %s3454_s4 = inlined_call_operand.vmem [shape: f32[1,128], index: 4, kind: input, shape index: {}]   ;;  %s3455_s5 = inlined_call_operand.vmem [shape: f32[48,128], index: 5, kind: output, shape index: {}]  }
   0x1   :  { %v2628_v0 = vld [vmem:[%s3450_s1 + $0x9c] sm:$0xff]   ;;  %v2629_v1 = vld [vmem:[%s3450_s1 + $0xa4] sm:$0xff]   ;;  %v2630_v2 = vld [vmem:[%s3450_s1 + $0xac] sm:$0xff]   ;;  %vm1440_vm4 = vsmask.f32 7424 }
   0x2   :  { %2423 = vmatprep.subr.bf16.mxu0 %v2628_v0  ;;  %v2635_v3 = vld [vmem:[%s3450_s1 + $0x34] sm:$0xff]   ;;  %v2792_v5 = vld [vmem:[%s3451_s0 + $0x8] sm:$0xf]  ;;  %v2797_v6 = vld [vmem:[%s3451_s0 + $0x10] sm:$0xf] }
   0x3   :  { %2424 = vmatpush3.bf16.msra.mxu0 %v2628_v0  ;;  %v2631_v4 = vld [vmem:[%s3450_s1 + $0xb4] sm:$0xff]   ;;  %2357 = vmatprep.subr.bf16.mxu1 %v2635_v3  ;;  %v2007_v7 = vcombine.low %v2792_v5, %v2797_v6  ;;  %v2641_v8 = vld [vmem:[%s3450_s1 + $0x3c] sm:$0xff]   ;;  %v2643_v10 = vld [vmem:[%s3450_s1 + $0x44] sm:$0xff]   ;;  %v43_v16 = vunpack.c.l.bf16 %v2792_v5  ;;  %v45_v20 = vunpack.c.l.bf16 %v2797_v6 }
   0x4   :  { %2425 = vmatprep.subr.bf16.mxu0 %v2629_v1  ;;  %2358 = vmatpush3.bf16.msra.mxu1 %v2635_v3  ;;  %v2632_v9 = vld [vmem:[%s3450_s1 + $0xbc] sm:$0xff]   ;;  %v2645_v12 = vld [vmem:[%s3450_s1 + $0x4c] sm:$0xff]   ;;  %v2633_v13 = vld [vmem:[%s3450_s1 + $0xc4] sm:$0xff]  }
   0x5   :  { %2437 = vmatprep.mubr.msk.bf16.mxu0 %vm184_vm0, %v2007_v7  ;;  %2359 = vmatprep.subr.bf16.mxu1 %v2641_v8  ;;  %v2814_v11 = vld [vmem:[%s3451_s0] sm:$0xf]  ;;  %v2634_v14 = vld [vmem:[%s3450_s1 + $0xcc] ss:$0 sps:$4 sm:$0xff]   ;;  %v2647_v17 = vld [vmem:[%s3450_s1 + $0x54] sm:$0xff]   ;;  %v98_v26 = vrot.slane %v43_v16, 1 }
   0x6   :  { %v41_v15 = vunpack.c.l.bf16 %v2814_v11  ;;  %v633_v18 = vsel %vm197_vm1, %v2634_v14, 0  ;;  %v2834_v19 = vld [vmem:[%s3451_s0 + $0x18] sm:$0xf]  ;;  %v2840_v21 = vld [vmem:[%s3451_s0 + $0x20] sm:$0xf]  ;;  %v2639_v24 = vld [vmem:[%s3450_s1 + $0xd0] sm:$0xff]  }
   0x7   :  { %2426 = vmatpush3.bf16.msra.mxu0 %v2629_v1  ;;  %v47_v23 = vunpack.c.l.bf16 %v2834_v19  ;;  %v2649_v25 = vld [vmem:[%s3450_s1 + $0x5c] sm:$0xff]   ;;  %v2856_v27 = vld [vmem:[%s3451_s0 + $0x28] sm:$0xf]  ;;  %v2861_v28 = vld [vmem:[%s3451_s0 + $0x4] sm:$0x1]  ;;  %v101_v35 = vrot.slane %v45_v20, 1  ;;  %v2008_v38 = vcombine.low %v2834_v19, %v2840_v21  ;;  %v49_v53 = vunpack.c.l.bf16 %v2840_v21 }
   0x8   :  { %2427 = vmatprep.subr.bf16.mxu0 %v2630_v2  ;;  %2360 = vmatpush3.bf16.msra.mxu1 %v2641_v8  ;;  %v95_v22 = vrot.slane %v41_v15, 1  ;;  %v2866_v29 = vld [vmem:[%s3451_s0 + $0xc] sm:$0x1]  ;;  %v2872_v30 = vld [vmem:[%s3451_s0 + $0x30] sm:$0xf]  ;;  %v42_v33 = vunpack.c.l.bf16 %v2861_v28  ;;  %v2642_v39 = vld [vmem:[%s3450_s1 + $0xd8] sm:$0xff]   ;;  %v51_v60 = vunpack.c.l.bf16 %v2856_v27 }
   0x9   :  { %2361 = vmatprep.subr.bf16.mxu1 %v2643_v10  ;;  %v2877_v31 = vld [vmem:[%s3451_s0 + $0x14] sm:$0x1]  ;;  %v2882_v32 = vld [vmem:[%s3451_s0 + $0x1c] sm:$0x1]  ;;  %v44_v34 = vunpack.c.l.bf16 %v2866_v29  ;;  %v104_v42 = vrot.slane %v47_v23, 1  ;;  %v2009_v43 = vcombine.low %v2856_v27, %v2872_v30  ;;  %v2655_v58 = vld [vmem:[%s3450_s1] sm:$0xff]   ;;  %v53_v61 = vunpack.c.l.bf16 %v2872_v30 }
   0xa   :  { %v46_v36 = vunpack.c.l.bf16 %v2877_v31  ;;  %v48_v37 = vunpack.c.l.bf16 %v2882_v32  ;;  %v96_v40 = vrot.slane %v42_v33, 1  ;;  %v2653_v44 = vld [vmem:[%s3450_s1 + $0x64] ss:$0 sps:$4 sm:$0xff]   ;;  %v2920_v50 = vld [vmem:[%s3451_s0 + $0x38] sm:$0xf]  ;;  %v2646_v63 = vld [vmem:[%s3450_s1 + $0xe8] sm:$0xff]  }
   0xb   :  { %2428 = vmatpush3.bf16.msra.mxu0 %v2630_v2  ;;  %v99_v41 = vrot.slane %v44_v34, 1  ;;  %v2913_v47 = vld [vmem:[%s3451_s0 + $0x24] sm:$0x1]  ;;  %v2925_v51 = vld [vmem:[%s3451_s0 + $0x40] sm:$0xf]  ;;  %v199_v56 = vsel %vm197_vm1, %v2653_v44, 0  ;;  %v55_v0 = vunpack.c.l.bf16 %v2920_v50 }
   0xc   :  { %2429 = vmatprep.subr.bf16.mxu0 %v2631_v4  ;;  %2362 = vmatpush3.bf16.msra.mxu1 %v2643_v10  ;;  %v102_v45 = vrot.slane %v46_v36, 1  ;;  %v105_v46 = vrot.slane %v48_v37, 1  ;;  %v97_v48 = vsel %vm94_vm2, %v95_v22, %v96_v40  ;;  %v50_v57 = vunpack.c.l.bf16 %v2913_v47  ;;  %v2644_v59 = vld [vmem:[%s3450_s1 + $0xe0] sm:$0xff]   ;;  %v2657_v7 = vld [vmem:[%s3450_s1 + $0x8] sm:$0xff]   ;;  %v2660_v31 = vld [vmem:[%s3450_s1 + $0x114] sm:$0xff]  }
   0xd   :  { %2363 = vmatprep.subr.bf16.mxu1 %v2645_v12  ;;  %v100_v49 = vsel %vm94_vm2, %v98_v26, %v99_v41  ;;  %v2010_v1 = vcombine.low %v2920_v50, %v2925_v51  ;;  %v107_v2 = vrot.slane %v49_v53, 1  ;;  %v2965_v8 = vld [vmem:[%s3451_s0 + $0x2c] sm:$0x1]  ;;  %v110_v10 = vrot.slane %v51_v60, 1  ;;  %v2648_v26 = vld [vmem:[%s3450_s1 + $0xf0] sm:$0xff]  }
   0xe   :  { %v127_v52 = vpack.c.bf16 %v100_v49, %v97_v48  ;;  %v103_v54 = vsel %vm94_vm2, %v101_v35, %v102_v45  ;;  %v2931_v55 = vsel %vm94_vm2, %v104_v42, %v105_v46  ;;  %v108_v3 = vrot.slane %v50_v57, 1  ;;  %v2661_v45 = vld [vmem:[%s3450_s1 + $0x18] sm:$0xff]  }
   0xf   :  { %2430 = vmatpush3.bf16.msra.mxu0 %v2631_v4  ;;  %v2946_v62 = vpack.c.bf16 %v2931_v55, %v103_v54  ;;  %v714_v4 = vpack.c.bf16 %v103_v54, %v100_v49  ;;  %v1944_v42 = vcombine.low %v2814_v11, %v2792_v5  ;;  %v2651_v48 = vld [vmem:[%s3450_s1 + $0xf8] sm:$0xff]   ;;  %v2654_v49 = vld [vmem:[%s3450_s1 + $0x100] ss:$0 sps:$4 sm:$0xff]   ;;  %v38_v54 = vld [vmem:[%s3451_s0 + $0x44] sm:$0x1]  ;;  %v392_v5 = vrot.slane %v45_v20, 2 }
  0x10   :  { %2431 = vmatprep.subr.bf16.mxu0 %v2632_v9  ;;  %2364 = vmatpush3.bf16.msra.mxu1 %v2645_v12  ;;  %v113_v12 = vrot.slane %v53_v61, 1  ;;  %v109_v35 = vsel %vm94_vm2, %v107_v2, %v108_v3  ;;  %v2656_v2 = vld [vmem:[%s3450_s1 + $0x104] sm:$0xff]   ;;  %v2658_v20 = vld [vmem:[%s3450_s1 + $0x10c] sm:$0xff]   ;;  %v393_v29 = vrot.slane %v46_v36, 2  ;;  %v2673_v11 = vld [vmem:[%s3450_s1 + $0x78] sm:$0xff]   ;;  %v404_v32 = vrot.slane %v53_v61, 2 }
  0x11   :  { %2365 = vmatprep.subr.bf16.mxu1 %v2647_v17  ;;  %2371 = vmatprep.mubr.msk.bf16.mxu1 %vm184_vm0, %v127_v52  ;;  %v2663_v52 = vld [vmem:[%s3450_s1 + $0x20] sm:$0xff]   ;;  %v715_v3 = vpack.c.bf16 %v109_v35, %v2931_v55 }
  0x13   :  { %2432 = vmatpush3.bf16.msra.mxu0 %v2632_v9  ;;  %v52_v9 = vunpack.c.l.bf16 %v2965_v8 }
  0x14   :  { %2433 = vmatprep.subr.bf16.mxu0 %v2633_v13  ;;  %2366 = vmatpush3.bf16.msra.mxu1 %v2647_v17 }
  0x15   :  { %2367 = vmatprep.subr.bf16.mxu1 %v2649_v25  ;;  %v111_v17 = vrot.slane %v52_v9, 1 }
  0x17   :  { %2434 = vmatpush3.bf16.msra.mxu0 %v2633_v13  ;;  %v2977_v13 = vld [vmem:[%s3451_s0 + $0x34] sm:$0x1] }
  0x18   :  { %2622 = vmatprep.subr.msk.bf16.mxu0 %vm197_vm1, %v2634_v14  ;;  %2368 = vmatpush3.bf16.msra.mxu1 %v2649_v25  ;;  %v2982_v14 = vld [vmem:[%s3451_s0 + $0x3c] sm:$0x1]  ;;  %v2659_v25 = vld [vmem:[%s3450_s1 + $0x10] sm:$0xff]  }
  0x19   :  { %2619 = vmatprep.subr.msk.bf16.mxu1 %vm197_vm1, %v2653_v44  ;;  %v56_v22 = vunpack.c.l.bf16 %v2982_v14  ;;  %v2674_v14 = vld [vmem:[%s3450_s1 + $0x148] sm:$0xff]  }
  0x1b   :  { %2436 = vmatpush3.bf16.msra.mxu0 %v633_v18  ;;  %v54_v18 = vunpack.c.l.bf16 %v2977_v13  ;;  %v117_v40 = vrot.slane %v56_v22, 1  ;;  %v407_v13 = vrot.slane %v55_v0, 2 }
  0x1c   :  { %2445 = vmatprep.subr.bf16.mxu0 %v2639_v24  ;;  %2370 = vmatpush3.bf16.msra.mxu1 %v199_v56  ;;  %v389_v56 = vrot.slane %v43_v16, 2  ;;  %v390_v16 = vrot.slane %v44_v34, 2 }
  0x1d   :  { %2379 = vmatprep.subr.bf16.mxu1 %v2655_v58 }
  0x1e   :  { %2438 = vmatmul.mubr.msk.bf16.vlgmr.msra.gmra.mrb[0].mxu0 %vm184_vm0, %v2008_v38  ;;  %v112_v38 = vsel %vm94_vm2, %v110_v10, %v111_v17  ;;  %v2669_v17 = vld [vmem:[%s3450_s1 + $0x68] sm:$0xff]   ;;  %v391_v36 = vsel %vm385_vm3, %v389_v56, %v390_v16 }
  0x1f   :  { %2446 = vmatpush3.bf16.msra.mxu0 %v2639_v24  ;;  %2441 = vmatprep.mubr.msk.bf16.mxu0 %vm184_vm0, %v2009_v43  ;;  %v116_v24 = vrot.slane %v55_v0, 1  ;;  %v3004_v41 = vpack.c.bf16 %v112_v38, %v109_v35  ;;  %v2664_v56 = vld [vmem:[%s3450_s1 + $0x124] sm:$0xff]  }
  0x20   :  { %2447 = vmatprep.subr.bf16.mxu0 %v2642_v39  ;;  %2372 = vmatmul.mubr.msk.bf16.vlgmr.msra.gmra.mrb[0].mxu1 %vm184_vm0, %v2946_v62 }
  0x21   :  { %2380 = vmatpush3.bf16.msra.mxu1 %v2655_v58  ;;  %v3010_v44 = vsel %vm94_vm2, %v116_v24, %v117_v40  ;;  %2375 = vmatprep.mubr.msk.bf16.mxu1 %vm184_vm0, %v3004_v41  ;;  %v57_v58 = vunpack.c.l.bf16 %v2925_v51  ;;  %v3074_v24 = vsel %vm385_vm3, %v392_v5, %v393_v29  ;;  %v387_v40 = vrot.slane %v42_v33, 2 }
  0x22   :  { %2381 = vmatprep.subr.bf16.mxu1 %v2657_v7  ;;  %v396_v29 = vrot.slane %v48_v37, 2  ;;  %v405_v37 = vrot.slane %v54_v18, 2 }
  0x23   :  { %2448 = vmatpush3.bf16.msra.mxu0 %v2642_v39  ;;  %v114_v39 = vrot.slane %v54_v18, 1  ;;  %v710_v10 = vrot.slane %v57_v58, 1  ;;  %v859_v28 = vrot.slane %v57_v58, 2  ;;  %v3123_v58 = vcombine.low %v2872_v30, %v2920_v50  ;;  %v2670_v30 = vld [vmem:[%s3450_s1 + $0x138] sm:$0xff]  }
  0x24   :  { %2449 = vmatprep.subr.bf16.mxu0 %v2644_v59  ;;  %v406_v61 = vsel %vm385_vm3, %v404_v32, %v405_v37  ;;  %v408_v18 = vrot.slane %v56_v22, 2 }
  0x25   :  { %2382 = vmatpush3.bf16.msra.mxu1 %v2657_v7  ;;  %v115_v43 = vsel %vm94_vm2, %v113_v12, %v114_v39  ;;  %v386_v39 = vrot.slane %v41_v15, 2  ;;  %v3108_v15 = vcombine.low %v2840_v21, %v2856_v27  ;;  %v401_v21 = vrot.slane %v51_v60, 2  ;;  %v2681_v27 = vld [vmem:[%s3450_s1 + $0x90] sm:$0xff]  }
  0x26   :  { %2442 = vmatmul.mubr.msk.bf16.gmra.mrb[4].mxu0 %vm184_vm0, %v2010_v1  ;;  %2383 = vmatprep.subr.bf16.mxu1 %v2659_v25  ;;  %v3016_v46 = vpack.c.bf16 %v3010_v44, %v115_v43  ;;  %v784_v1 = vsel %vm197_vm1, %v2654_v49, 0  ;;  %v716_v7 = vpack.c.bf16 %v115_v43, %v112_v38  ;;  %v409_v50 = vsel %vm385_vm3, %v407_v13, %v408_v18 }
  0x27   :  { %2450 = vmatpush3.bf16.msra.mxu0 %v2644_v59  ;;  %2459 = vmatprep.mubr.msk.bf16.mxu0 %vm184_vm0, %v714_v4  ;;  %v2665_v59 = vld [vmem:[%s3450_s1 + $0x28] sm:$0xff]   ;;  %v2667_v4 = vld [vmem:[%s3450_s1 + $0x30] ss:$0 sps:$4 sm:$0xff]  }
  0x28   :  { %2451 = vmatprep.subr.bf16.mxu0 %v2646_v63  ;;  %2376 = vmatmul.mubr.msk.bf16.gmra.mrb[4].mxu1 %vm184_vm0, %v3016_v46  ;;  %v318_v55 = vsel %vm197_vm1, %v2667_v4, 0 }
  0x29   :  { %2384 = vmatpush3.bf16.msra.mxu1 %v2659_v25  ;;  %2393 = vmatprep.mubr.msk.bf16.mxu1 %vm184_vm0, %v1944_v42  ;;  %v3079_v25 = vld [vmem:[%s3451_s0 + $0x48] sm:$0xf]  ;;  %v2662_v42 = vld [vmem:[%s3450_s1 + $0x11c] sm:$0xff]  }
  0x2a   :  { %2385 = vmatprep.subr.bf16.mxu1 %v2661_v45  ;;  %v2083_v35 = vcombine.low %v2925_v51, %v3079_v25  ;;  %v59_v43 = vunpack.c.l.bf16 %v3079_v25  ;;  %v2692_v51 = vld [vmem:[%s3450_s1 + $0x19c] ss:$0 sps:$4 sm:$0xff]   ;;  %v2693_v25 = vld [vmem:[%s3450_s1 + $0x1a0] sm:$0xff]  }
  0x2b   :  { %2452 = vmatpush3.bf16.msra.mxu0 %v2646_v63  ;;  %v58_v63 = vunpack.c.l.bf16 %v38_v54 }
  0x2c   :  { %2453 = vmatprep.subr.bf16.mxu0 %v2648_v26 }
  0x2d   :  { %2386 = vmatpush3.bf16.msra.mxu1 %v2661_v45  ;;  %v711_v12 = vrot.slane %v58_v63, 1  ;;  %v860_v33 = vrot.slane %v58_v63, 2  ;;  %v40_v45 = vld [vmem:[%s3451_s0 + $0x4c] sm:$0x1] }
  0x2e   :  { %2387 = vmatprep.subr.bf16.mxu1 %v2663_v52  ;;  %v60_v54 = vunpack.c.l.bf16 %v40_v45  ;;  %v2690_v45 = vld [vmem:[%s3450_s1 + $0x194] sm:$0xff]  }
  0x2f   :  { %2454 = vmatpush3.bf16.msra.mxu0 %v2648_v26  ;;  %v3062_v34 = vsel %vm94_vm2, %v710_v10, %v711_v12  ;;  %v3083_v26 = vcombine.low %v2797_v6, %v2834_v19  ;;  %v863_v6 = vpack.c.bf16 %v3074_v24, %v391_v36  ;;  %v3129_v5 = vsel %vm385_vm3, %v859_v28, %v860_v33  ;;  %v2668_v19 = vld [vmem:[%s3450_s1 + $0x134] ss:$0 sps:$4 sm:$0xff]   ;;  %v2687_v28 = vld [vmem:[%s3450_s1 + $0x17c] sm:$0xff]   ;;  %v2688_v33 = vld [vmem:[%s3450_s1 + $0x184] sm:$0xff]  }
  0x30   :  { %2455 = vmatprep.subr.bf16.mxu0 %v2651_v48  ;;  %v717_v38 = vpack.c.bf16 %v3062_v34, %v3010_v44  ;;  %v2671_v44 = vld [vmem:[%s3450_s1 + $0x70] sm:$0xff]   ;;  %v1281_v63 = vrot.slane %v60_v54, 2  ;;  %v395_v12 = vrot.slane %v47_v23, 2  ;;  %v402_v23 = vrot.slane %v52_v9, 2 }
  0x31   :  { %2388 = vmatpush3.bf16.msra.mxu1 %v2663_v52  ;;  %v1280_v52 = vrot.slane %v59_v43, 2 }
  0x32   :  { %2389 = vmatprep.subr.bf16.mxu1 %v2665_v59  ;;  %v397_v47 = vsel %vm385_vm3, %v395_v12, %v396_v29  ;;  %v403_v60 = vsel %vm385_vm3, %v401_v21, %v402_v23  ;;  %v2713_v12 = vld [vmem:[%s3452_s3 + $0x30] sm:$0xff]   ;;  %v2715_v29 = vld [vmem:[%s3452_s3 + $0x38] sm:$0xff]  }
  0x33   :  { %2456 = vmatpush3.bf16.msra.mxu0 %v2651_v48  ;;  %v388_v48 = vsel %vm385_vm3, %v386_v39, %v387_v40  ;;  %v865_v9 = vpack.c.bf16 %v406_v61, %v403_v60  ;;  %v3200_v22 = vpack.c.bf16 %v397_v47, %v3074_v24  ;;  %v2676_v40 = vld [vmem:[%s3450_s1 + $0x150] sm:$0xff]   ;;  %v2678_v24 = vld [vmem:[%s3450_s1 + $0x158] sm:$0xff]  }
  0x34   :  { %2623 = vmatprep.subr.msk.bf16.mxu0 %vm197_vm1, %v2654_v49  ;;  %v1143_v49 = vrot.slane %v59_v43, 1 }
  0x35   :  { %2390 = vmatpush3.bf16.msra.mxu1 %v2665_v59  ;;  %v1144_v59 = vrot.slane %v60_v54, 1  ;;  %v2700_v54 = vld [vmem:[%s3452_s3 + $0x40] sm:$0xff]  }
  0x36   :  { %2620 = vmatprep.subr.msk.bf16.mxu1 %vm197_vm1, %v2667_v4  ;;  %v2666_v4 = vld [vmem:[%s3450_s1 + $0x12c] sm:$0xff]  }
  0x37   :  { %2458 = vmatpush3.bf16.msra.mxu0 %v784_v1  ;;  %v418_v1 = vpack.c.bf16 %v391_v36, %v388_v48  ;;  %v3132_v16 = vsel %vm94_vm2, %v1143_v49, %v1144_v59  ;;  %v2672_v36 = vld [vmem:[%s3450_s1 + $0x140] sm:$0xff]   ;;  %v2695_v48 = vld [vmem:[%s3450_s1 + $0x1b0] sm:$0xff]   ;;  %v2696_v49 = vld [vmem:[%s3450_s1 + $0x1b8] sm:$0xff]  }
  0x38   :  { %2467 = vmatprep.subr.bf16.mxu0 %v2656_v2  ;;  %v2703_v59 = vld [vmem:[%s3452_s3 + $0x8] sm:$0xff]  }
  0x39   :  { %2392 = vmatpush3.bf16.msra.mxu1 %v318_v55  ;;  %v399_v55 = vrot.slane %v50_v57, 2  ;;  %v933_v57 = vsel %vm197_vm1, %v2668_v19, 0 }
  0x3a   :  { %2460 = vmatmul.mubr.msk.bf16.vlgmr.msra.gmra.mrb[0].mxu0 %vm184_vm0, %v715_v3  ;;  %2401 = vmatprep.subr.bf16.mxu1 %v2669_v17  ;;  %v3135_v3 = vsel %vm385_vm3, %v1280_v52, %v1281_v63  ;;  %v2704_v63 = vld [vmem:[%s3452_s3 + $0x50] sm:$0xff]  }
  0x3b   :  { %2468 = vmatpush3.bf16.msra.mxu0 %v2656_v2  ;;  %2463 = vmatprep.mubr.msk.bf16.mxu0 %vm184_vm0, %v716_v7  ;;  %v2675_v2 = vld [vmem:[%s3450_s1 + $0x80] sm:$0xff]   ;;  %v1147_v7 = vpack.c.bf16 %v3132_v16, %v3062_v34  ;;  %v1284_v10 = vpack.c.bf16 %v3135_v3, %v3129_v5  ;;  %v2699_v34 = vld [vmem:[%s3450_s1 + $0x1d0] ss:$0 sps:$4 sm:$0xff]  }
  0x3c   :  { %2469 = vmatprep.subr.bf16.mxu0 %v2658_v20  ;;  %2394 = vmatmul.mubr.msk.bf16.vlgmr.msra.gmra.mrb[0].mxu1 %vm184_vm0, %v3083_v26  ;;  %v1342_v52 = vsel %vm197_vm1, %v2699_v34, 0  ;;  %v2708_v16 = vld [vmem:[%s3452_s3 + $0x60] sm:$0xff]  }
  0x3d   :  { %2402 = vmatpush3.bf16.msra.mxu1 %v2669_v17  ;;  %2397 = vmatprep.mubr.msk.bf16.mxu1 %vm184_vm0, %v3108_v15  ;;  %v2677_v17 = vld [vmem:[%s3450_s1 + $0x88] sm:$0xff]   ;;  %v2709_v3 = vld [vmem:[%s3452_s3 + $0x20] sm:$0xff]  }
  0x3e   :  { %2403 = vmatprep.subr.bf16.mxu1 %v2671_v44 }
  0x3f   :  { %2470 = vmatpush3.bf16.msra.mxu0 %v2658_v20  ;;  %v398_v20 = vrot.slane %v49_v53, 2 }
  0x40   :  { %2471 = vmatprep.subr.bf16.mxu0 %v2660_v31 }
  0x41   :  { %2404 = vmatpush3.bf16.msra.mxu1 %v2671_v44  ;;  %v400_v53 = vsel %vm385_vm3, %v398_v20, %v399_v55  ;;  %v2685_v44 = vld [vmem:[%s3450_s1 + $0x16c] sm:$0xff]   ;;  %v2714_v20 = vld [vmem:[%s3452_s3 + $0x78] sm:$0xff]   ;;  %v2716_v55 = vld [vmem:[%s3452_s3 + $0xc0] sm:$0xff]  }
  0x42   :  { %2464 = vmatmul.mubr.msk.bf16.gmra.mrb[4].mxu0 %vm184_vm0, %v717_v38  ;;  %2405 = vmatprep.subr.bf16.mxu1 %v2673_v11  ;;  %v864_v8 = vpack.c.bf16 %v400_v53, %v397_v47  ;;  %v866_v38 = vpack.c.bf16 %v3129_v5, %v409_v50  ;;  %v3203_v39 = vpack.c.bf16 %v403_v60, %v400_v53  ;;  %v2707_v5 = vld [vmem:[%s3452_s3 + $0x18] sm:$0xff]   ;;  %v2156_v60 = vld [vmem:[%s3453_s2] ss:$0 sm:$0xff] }
  0x43   :  { %2472 = vmatpush3.bf16.msra.mxu0 %v2660_v31  ;;  %2481 = vmatprep.mubr.msk.bf16.mxu0 %vm184_vm0, %v863_v6  ;;  %v2683_v31 = vld [vmem:[%s3450_s1 + $0x98] ss:$0 sps:$4 sm:$0xff]   ;;  %v2682_v6 = vld [vmem:[%s3450_s1 + $0x160] sm:$0xff]  }
  0x44   :  { %2473 = vmatprep.subr.bf16.mxu0 %v2662_v42  ;;  %2398 = vmatmul.mubr.msk.bf16.gmra.mrb[4].mxu1 %vm184_vm0, %v3123_v58  ;;  %v488_v0 = vsel %vm197_vm1, %v2683_v31, 0 }
  0x45   :  { %2406 = vmatpush3.bf16.msra.mxu1 %v2673_v11  ;;  %2415 = vmatprep.mubr.msk.bf16.mxu1 %vm184_vm0, %v418_v1  ;;  %v2686_v11 = vld [vmem:[%s3450_s1 + $0x174] sm:$0xff]  }
  0x46   :  { %2407 = vmatprep.subr.bf16.mxu1 %v2675_v2  ;;  %v2705_v1 = vld [vmem:[%s3452_s3 + $0x10] sm:$0xff]  }
  0x47   :  { %2474 = vmatpush3.bf16.msra.mxu0 %v2662_v42  ;;  %v3218_v42 = vpack.c.bf16 %v409_v50, %v406_v61 }
  0x48   :  { %2475 = vmatprep.subr.bf16.mxu0 %v2664_v56 }
  0x49   :  { %2408 = vmatpush3.bf16.msra.mxu1 %v2675_v2  ;;  %v2706_v2 = vld [vmem:[%s3452_s3 + $0x58] sm:$0xff]  }
  0x4a   :  { %2409 = vmatprep.subr.bf16.mxu1 %v2677_v17 }
  0x4b   :  { %2476 = vmatpush3.bf16.msra.mxu0 %v2664_v56  ;;  %v2701_v56 = vld [vmem:[%s3452_s3] sm:$0xff]  }
  0x4c   :  { %2477 = vmatprep.subr.bf16.mxu0 %v2666_v4 }
  0x4d   :  { %2410 = vmatpush3.bf16.msra.mxu1 %v2677_v17 }
  0x4e   :  { %2411 = vmatprep.subr.bf16.mxu1 %v2681_v27 }
  0x4f   :  { %2478 = vmatpush3.bf16.msra.mxu0 %v2666_v4  ;;  %v2710_v4 = vld [vmem:[%s3452_s3 + $0x68] sm:$0xff]  }
  0x50   :  { %2624 = vmatprep.subr.msk.bf16.mxu0 %vm197_vm1, %v2668_v19 }
  0x51   :  { %2412 = vmatpush3.bf16.msra.mxu1 %v2681_v27 }
  0x52   :  { %2621 = vmatprep.subr.msk.bf16.mxu1 %vm197_vm1, %v2683_v31 }
  0x53   :  { %2480 = vmatpush3.bf16.msra.mxu0 %v933_v57 }
  0x54   :  { %2489 = vmatprep.subr.bf16.mxu0 %v2670_v30 }
  0x55   :  { %2414 = vmatpush3.bf16.msra.mxu1 %v488_v0 }
  0x56   :  { %2482 = vmatmul.mubr.msk.bf16.vlgmr.msra.gmra.mrb[0].mxu0 %vm184_vm0, %v864_v8  ;;  %2289 = vmatprep.subr.bf16.mxu1 %v2700_v54  ;;  %v2717_v54 = vld [vmem:[%s3452_s3 + $0x80] sm:$0xff]  }
  0x57   :  { %2490 = vmatpush3.bf16.msra.mxu0 %v2670_v30  ;;  %2485 = vmatprep.mubr.msk.bf16.mxu0 %vm184_vm0, %v865_v9 }
  0x58   :  { %2491 = vmatprep.subr.bf16.mxu0 %v2672_v36  ;;  %2416 = vmatmul.mubr.msk.bf16.vlgmr.msra.gmra.mrb[0].mxu1 %vm184_vm0, %v3200_v22 }
  0x59   :  { %2419 = vmatprep.mubr.msk.bf16.mxu1 %vm184_vm0, %v3203_v39  ;;  %2290 = vmatpush3.bf16.msra.mxu1 %v2701_v56 }
  0x5b   :  { %2492 = vmatpush3.bf16.msra.mxu0 %v2672_v36 }
  0x5c   :  { %2493 = vmatprep.subr.bf16.mxu0 %v2674_v14 }
  0x5e   :  { %2486 = vmatmul.mubr.msk.bf16.gmra.mrb[4].mxu0 %vm184_vm0, %v866_v38 }
  0x5f   :  { %2494 = vmatpush3.bf16.msra.mxu0 %v2674_v14  ;;  %2503 = vmatprep.mubr.msk.bf16.mxu0 %vm184_vm0, %v3083_v26  ;;  %v2684_v26 = vld [vmem:[%s3450_s1 + $0x168] ss:$0 sps:$4 sm:$0xff]  }
  0x60   :  { %2495 = vmatprep.subr.bf16.mxu0 %v2676_v40  ;;  %2420 = vmatmul.mubr.msk.bf16.gmra.mrb[4].mxu1 %vm184_vm0, %v3218_v42  ;;  %v1066_v43 = vsel %vm197_vm1, %v2684_v26, 0 }
  0x63   :  { %2496 = vmatpush3.bf16.msra.mxu0 %v2676_v40 }
  0x64   :  { %2497 = vmatprep.subr.bf16.mxu0 %v2678_v24 }
  0x67   :  { %2498 = vmatpush3.bf16.msra.mxu0 %v2678_v24 }
  0x68   :  { %2499 = vmatprep.subr.bf16.mxu0 %v2682_v6 }
  0x6b   :  { %2500 = vmatpush3.bf16.msra.mxu0 %v2682_v6 }
  0x6c   :  { %2625 = vmatprep.subr.msk.bf16.mxu0 %vm197_vm1, %v2684_v26 }
  0x6f   :  { %2502 = vmatpush3.bf16.msra.mxu0 %v1066_v43 }
  0x70   :  { %2511 = vmatprep.subr.bf16.mxu0 %v2685_v44 }
  0x72   :  { %2504 = vmatmul.mubr.msk.bf16.vlgmr.msra.gmra.mrb[0].mxu0 %vm184_vm0, %v3108_v15  ;;  %v2689_v15 = vld [vmem:[%s3450_s1 + $0x18c] sm:$0xff]  }
  0x73   :  { %2512 = vmatpush3.bf16.msra.mxu0 %v2685_v44  ;;  %2507 = vmatprep.mubr.msk.bf16.mxu0 %vm184_vm0, %v3123_v58  ;;  %v2702_v58 = vld [vmem:[%s3452_s3 + $0x48] sm:$0xff]  }
  0x74   :  { %2513 = vmatprep.subr.bf16.mxu0 %v2686_v11  ;;  %2291 = vmatprep.subr.bf16.mxu1 %v2702_v58 }
  0x75   :  { %2292 = vmatpush3.bf16.msra.mxu1 %v2703_v59 }
  0x76   :  { %2293 = vmatprep.subr.bf16.mxu1 %v2704_v63 }
  0x77   :  { %2514 = vmatpush3.bf16.msra.mxu0 %v2686_v11 }
  0x78   :  { %2515 = vmatprep.subr.bf16.mxu0 %v2687_v28 }
  0x79   :  { %2294 = vmatpush3.bf16.msra.mxu1 %v2705_v1  ;;  %v2718_v1 = vld [vmem:[%s3452_s3 + $0xc8] sm:$0xff]  }
  0x7a   :  { %2508 = vmatmul.mubr.msk.bf16.gmra.mrb[4].mxu0 %vm184_vm0, %v2083_v35  ;;  %v2694_v35 = vld [vmem:[%s3450_s1 + $0x1a8] sm:$0xff]   ;;  %2295 = vmatprep.subr.bf16.mxu1 %v2706_v2 }
  0x7b   :  { %2516 = vmatpush3.bf16.msra.mxu0 %v2687_v28  ;;  %2525 = vmatprep.mubr.msk.bf16.mxu0 %vm184_vm0, %v2946_v62  ;;  %v1205_v62 = vsel %vm197_vm1, %v2692_v51, 0 }
  0x7c   :  { %2517 = vmatprep.subr.bf16.mxu0 %v2688_v33 }
  0x7d   :  { %2296 = vmatpush3.bf16.msra.mxu1 %v2707_v5 }
  0x7e   :  { %2297 = vmatprep.subr.bf16.mxu1 %v2708_v16 }
  0x7f   :  { %2518 = vmatpush3.bf16.msra.mxu0 %v2688_v33 }
  0x80   :  { %2519 = vmatprep.subr.bf16.mxu0 %v2689_v15 }
  0x81   :  { %2298 = vmatpush3.bf16.msra.mxu1 %v2709_v3 }
  0x82   :  { %2299 = vmatprep.subr.bf16.mxu1 %v2710_v4 }
  0x83   :  { %2520 = vmatpush3.bf16.msra.mxu0 %v2689_v15 }
  0x84   :  { %2521 = vmatprep.subr.bf16.mxu0 %v2690_v45 }
  0x87   :  { %2522 = vmatpush3.bf16.msra.mxu0 %v2690_v45 }
  0x88   :  { %2626 = vmatprep.subr.msk.bf16.mxu0 %vm197_vm1, %v2692_v51 }
  0x8b   :  { %2524 = vmatpush3.bf16.msra.mxu0 %v1205_v62 }
  0x8c   :  { %2533 = vmatprep.subr.bf16.mxu0 %v2693_v25 }
  0x8e   :  { %2526 = vmatmul.mubr.msk.bf16.vlgmr.msra.gmra.mrb[0].mxu0 %vm184_vm0, %v3004_v41  ;;  %v2697_v41 = vld [vmem:[%s3450_s1 + $0x1c0] sm:$0xff]  }
  0x8f   :  { %2534 = vmatpush3.bf16.msra.mxu0 %v2693_v25  ;;  %2529 = vmatprep.mubr.msk.bf16.mxu0 %vm184_vm0, %v3016_v46  ;;  %v2698_v46 = vld [vmem:[%s3450_s1 + $0x1c8] sm:$0xff]  }
  0x90   :  { %2535 = vmatprep.subr.bf16.mxu0 %v2694_v35 }
  0x93   :  { %2536 = vmatpush3.bf16.msra.mxu0 %v2694_v35 }
  0x94   :  { %2537 = vmatprep.subr.bf16.mxu0 %v2695_v48 }
  0x96   :  { %2530 = vmatmul.mubr.msk.bf16.gmra.mrb[4].mxu0 %vm184_vm0, %v1147_v7  ;;  %v2711_v7 = vld [vmem:[%s3452_s3 + $0x28] sm:$0xff]  }
  0x97   :  { %2538 = vmatpush3.bf16.msra.mxu0 %v2695_v48  ;;  %2547 = vmatprep.mubr.msk.bf16.mxu0 %vm184_vm0, %v3200_v22 }
  0x98   :  { %2539 = vmatprep.subr.bf16.mxu0 %v2696_v49  ;;  %2300 = vmatpush3.bf16.msra.mxu1 %v2711_v7 }
  0x9b   :  { %2540 = vmatpush3.bf16.msra.mxu0 %v2696_v49 }
  0x9c   :  { %2541 = vmatprep.subr.bf16.mxu0 %v2697_v41 }
  0x9f   :  { %2542 = vmatpush3.bf16.msra.mxu0 %v2697_v41 }
  0xa0   :  { %2543 = vmatprep.subr.bf16.mxu0 %v2698_v46 }
  0xa3   :  { %2544 = vmatpush3.bf16.msra.mxu0 %v2698_v46 }
  0xa4   :  { %2627 = vmatprep.subr.msk.bf16.mxu0 %vm197_vm1, %v2699_v34 }
  0xa7   :  { %2546 = vmatpush3.bf16.msra.mxu0 %v1342_v52 }
  0xaa   :  { %2548 = vmatmul.mubr.msk.bf16.vlgmr.msra.gmra.mrb[0].mxu0 %vm184_vm0, %v3203_v39 }
  0xab   :  { %2551 = vmatprep.mubr.msk.bf16.mxu0 %vm184_vm0, %v3218_v42 }
  0xb2   :  { %2552 = vmatmul.mubr.msk.bf16.gmra.mrb[4].mxu0 %vm184_vm0, %v1284_v10  ;;  %v2712_v10 = vld [vmem:[%s3452_s3 + $0x70] sm:$0xff]  }
  0xb3   :  { %2301 = vmatprep.subr.bf16.mxu1 %v2712_v10 }
  0xb4   :  { %2302 = vmatpush3.bf16.msra.mxu1 %v2713_v12 }
  0xb5   :  { %2303 = vmatprep.subr.bf16.mxu1 %v2714_v20 }
  0xb8   :  { %2304 = vmatpush3.bf16.msra.mxu1 %v2715_v29  ;;  %v2719_v29 = vld [vmem:[%s3452_s3 + $0x88] sm:$0xff]  }
  0xb9   :  { %2323 = vmatprep.subr.bf16.mxu1 %v2716_v55 }
 0x12b   :  { %v2417_v17 = vpop.f32.mrb[0].mxu1 }
 0x12c   :  { %v524_v19 = vpop.f32.mrb[1].mxu1 }
 0x12d   :  { %v2418_v21 = vpop.f32.mrb[2].mxu1 }
 0x12e   :  { %v527_v23 = vpop.f32.mrb[3].mxu1 }
 0x133   :  { %v2421_v32 = vpop.f32.mrb[4].mxu1 }
 0x134   :  { %v540_v37 = vpop.f32.mrb[5].mxu1 }
 0x135   :  { %v2422_v47 = vpop.f32.mrb[6].mxu1 }
 0x136   :  { %v543_v53 = vpop.f32.mrb[7].mxu1 }
 0x17d   :  { %v2549_v27 = vpop.f32.mrb[0].mxu0 }
 0x17e   :  { %v2555_v57 = vadd.f32 %v2549_v27, %v2417_v17  ;;  %v1378_v30 = vpop.f32.mrb[1].mxu0 }
 0x17f   :  { %v2556_v61 = vadd.f32 %v1378_v30, %v524_v19  ;;  %v2550_v8 = vpop.f32.mrb[2].mxu0 }
 0x180   :  { %v2557_v9 = vadd.f32 %v2550_v8, %v2418_v21  ;;  %v1381_v13 = vpop.f32.mrb[3].mxu0  ;;  %v1426_v31 = vadd.f32 %v2555_v57, %v2156_v60  ;;  %v2721_v8 = vld [vmem:[%s3452_s3 + $0x90] sm:$0xff]  }
 0x181   :  { %v2558_v18 = vadd.f32 %v1381_v13, %v527_v23  ;;  %v1424_v50 = vadd.f32 %v2556_v61, %v2156_v60  ;;  %v2720_v23 = vld [vmem:[%s3452_s3 + $0xd0] sm:$0xff]   ;;  %v2722_v13 = vld [vmem:[%s3452_s3 + $0xd8] sm:$0xff]  }
 0x182   :  { %v1427_v36 = vadd.f32 %v2557_v9, %v2156_v60 }
 0x183   :  { %v1425_v0 = vadd.f32 %v2558_v18, %v2156_v60 }
 0x184   :  { %v3358_v14 = vpack.c.bf16 %v1427_v36, %v1426_v31 }
 0x185   :  { %v1432_v22 = vpack.c.bf16 %v1425_v0, %v1424_v50  ;;  %v3360_v38 = vpack.c.bf16 %v1426_v31, %v1425_v0  ;;  %v2553_v39 = vpop.f32.mrb[4].mxu0  ;;  %v2723_v31 = vld [vmem:[%s3452_s3 + $0x98] sm:$0xff]   ;;  %v2725_v50 = vld [vmem:[%s3452_s3 + $0xa0] sm:$0xff]   ;;  %v2726_v0 = vld [vmem:[%s3452_s3 + $0xe8] sm:$0xff]  }
 0x186   :  { %v2559_v40 = vadd.f32 %v2553_v39, %v2421_v32  ;;  %v1394_v24 = vpop.f32.mrb[5].mxu0  ;;  %v1449_v43 = vshll.u32 %v3358_v14, 16  ;;  %v1453_v3 = vshrl.u32 %v3358_v14, 16  ;;  %v2729_v39 = vld [vmem:[%s3452_s3 + $0xb0] sm:$0xff]  }
 0x187   :  { %v2560_v42 = vadd.f32 %v1394_v24, %v540_v37  ;;  %v2554_v6 = vpop.f32.mrb[6].mxu0  ;;  %v1444_v26 = vshll.u32 %v1432_v22, 16  ;;  %v1475_v33 = vshll.u32 %v3360_v38, 16  ;;  %v1442_v51 = vshrl.u32 %v1432_v22, 16  ;;  %v2731_v24 = vld [vmem:[%s3452_s3 + $0xb8] sm:$0xff]  }
 0x188   :  { %v1430_v44 = vadd.f32 %v2559_v40, %v2156_v60  ;;  %v2561_v11 = vadd.f32 %v2554_v6, %v2422_v47  ;;  %v1397_v28 = vpop.f32.mrb[7].mxu0  ;;  %v1451_v34 = vrot.slane %v1449_v43, 1  ;;  %v1473_v56 = vshrl.u32 %v3360_v38, 16  ;;  %v2730_v40 = vld [vmem:[%s3452_s3 + $0xf8] sm:$0xff]  }
 0x189   :  { %v1428_v15 = vadd.f32 %v2560_v42, %v2156_v60  ;;  %v2562_v45 = vadd.f32 %v1397_v28, %v543_v53  ;;  %v1446_v62 = vrot.slane %v1444_v26, 1  ;;  %v1477_v48 = vrot.slane %v1475_v33, 1 }
 0x18a   :  { %v1435_v25 = vpack.c.bf16 %v1430_v44, %v1430_v44  ;;  %v1431_v35 = vadd.f32 %v2561_v11, %v2156_v60  ;;  %v1455_v55 = vor.u32 %v1453_v3, %v1451_v34 }
 0x18b   :  { %v3364_v49 = vpack.c.bf16 %v1428_v15, %v1427_v36  ;;  %v1429_v41 = vadd.f32 %v2562_v45, %v2156_v60  ;;  %v1447_v46 = vor.u32 %v1446_v62, %v1442_v51  ;;  %v1478_v4 = vor.u32 %v1477_v48, %v1473_v56  ;;  %v2724_v36 = vld [vmem:[%s3452_s3 + $0xe0] sm:$0xff]  }
 0x18c   :  { %v1439_v52 = vpack.c.bf16 %v1431_v35, %v1431_v35  ;;  %v1465_v5 = vshll.u32 %v1435_v25, 16 }
 0x18d   :  { %v1434_v58 = vpack.c.bf16 %v1429_v41, %v1428_v15  ;;  %v3370_v59 = vpack.c.bf16 %v1430_v44, %v1429_v41  ;;  %v1452_v63 = vsel %vm1440_vm4, %v1447_v46, %v1451_v34  ;;  %v1480_v2 = vshll.u32 %v3364_v49, 16  ;;  %v2157_v46 = vld [vmem:[%s3454_s4] ss:$0 sm:$0xff] }
 0x18e   :  { %v1496_v16 = vshll.u32 %v1439_v52, 16  ;;  %1798 = vmatprep.mubr.bf16.mxu1 %v1452_v63  ;;  %v1484_v12 = vshrl.u32 %v3364_v49, 16  ;;  %v1467_v53 = vrot.slane %v1465_v5, 1 }
 0x18f   :  { %1799 = vmatmul.mubr.bf16.vlgmr.msra.gmra.mrb[8].mxu1 %v1432_v22  ;;  %v1457_v7 = vshll.u32 %v1434_v58, 16  ;;  %v1482_v10 = vrot.slane %v1480_v2, 1  ;;  %v1488_v20 = vshll.u32 %v3370_v59, 16  ;;  %v1461_v17 = vshrl.u32 %v1434_v58, 16  ;;  %v2728_v22 = vld [vmem:[%s3452_s3 + $0xf0] sm:$0xff]  }
 0x190   :  { %2324 = vmatpush3.bf16.msra.mxu1 %v2717_v54  ;;  %v1492_v19 = vshrl.u32 %v3370_v59, 16  ;;  %v1498_v27 = vrot.slane %v1496_v16, 1 }
 0x191   :  { %2325 = vmatprep.subr.bf16.mxu1 %v2718_v1  ;;  %v1459_v21 = vrot.slane %v1457_v7, 1  ;;  %v1483_v32 = vsel %vm1440_vm4, %v1478_v4, %v1482_v10  ;;  %v1486_v37 = vor.u32 %v1484_v12, %v1482_v10  ;;  %v1490_v47 = vrot.slane %v1488_v20, 1 }
 0x193   :  { %v1460_v57 = vsel %vm1440_vm4, %v1455_v55, %v1459_v21  ;;  %v1463_v30 = vor.u32 %v1461_v17, %v1459_v21  ;;  %v1491_v60 = vsel %vm1440_vm4, %v1486_v37, %v1490_v47  ;;  %v1494_v61 = vor.u32 %v1492_v19, %v1490_v47 }
 0x194   :  { %2326 = vmatpush3.bf16.msra.mxu1 %v2719_v29  ;;  %1806 = vmatprep.mubr.bf16.mxu1 %v1460_v57 }
 0x195   :  { %2327 = vmatprep.subr.bf16.mxu1 %v2720_v23  ;;  %v1468_v9 = vsel %vm1440_vm4, %v1463_v30, %v1467_v53  ;;  %v1499_v18 = vsel %vm1440_vm4, %v1494_v61, %v1498_v27 }
 0x197   :  { %1807 = vmatmul.mubr.bf16.gmra.mrb[12].mxu1 %v3358_v14  ;;  %v2727_v14 = vld [vmem:[%s3452_s3 + $0xa8] sm:$0xff]  }
 0x198   :  { %2328 = vmatpush3.bf16.msra.mxu1 %v2721_v8  ;;  %1814 = vmatprep.mubr.bf16.mxu1 %v1468_v9 }
 0x199   :  { %2329 = vmatprep.subr.bf16.mxu1 %v2722_v13 }
 0x19c   :  { %2330 = vmatpush3.bf16.msra.mxu1 %v2723_v31 }
 0x19d   :  { %2331 = vmatprep.subr.bf16.mxu1 %v2724_v36 }
 0x19f   :  { %1815 = vmatmul.mubr.bf16.gmra.mrb[16].mxu1 %v1434_v58 }
 0x1a0   :  { %2332 = vmatpush3.bf16.msra.mxu1 %v2725_v50  ;;  %1855 = vmatprep.mubr.bf16.mxu1 %v1483_v32 }
 0x1a1   :  { %2333 = vmatprep.subr.bf16.mxu1 %v2726_v0 }
 0x1a4   :  { %2334 = vmatpush3.bf16.msra.mxu1 %v2727_v14 }
 0x1a5   :  { %2335 = vmatprep.subr.bf16.mxu1 %v2728_v22 }
 0x1a8   :  { %2336 = vmatpush3.bf16.msra.mxu1 %v2729_v39 }
 0x1a9   :  { %2337 = vmatprep.subr.bf16.mxu1 %v2730_v40 }
 0x1ac   :  { %2338 = vmatpush3.bf16.msra.mxu1 %v2731_v24 }
 0x1af   :  { %1856 = vmatmul.mubr.bf16.vlgmr.msra.gmra.mrb[20].mxu1 %v3360_v38 }
 0x1b0   :  { %1863 = vmatprep.mubr.bf16.mxu1 %v1491_v60 }
 0x1b7   :  { %1864 = vmatmul.mubr.bf16.gmra.mrb[24].mxu1 %v3364_v49 }
 0x1b8   :  { %1871 = vmatprep.mubr.bf16.mxu1 %v1499_v18 }
 0x1bf   :  { %1872 = vmatmul.mubr.bf16.gmra.mrb[28].mxu1 %v3370_v59 }
 0x262   :  { %v2305_v42 = vpop.f32.mrb[8].mxu1 }
 0x263   :  { %v2306_v6 = vpop.f32.mrb[9].mxu1 }
 0x264   :  { %v2307_v26 = vadd.f32 %v2306_v6, %v2305_v42  ;;  %v2308_v43 = vpop.f32.mrb[10].mxu1 }
 0x265   :  { %v2309_v44 = vpop.f32.mrb[11].mxu1 }
 0x266   :  { %v2310_v11 = vadd.f32 %v2309_v44, %v2308_v43  ;;  %v1801_v54 = vadd.f32 %v2307_v26, %v2157_v46 }
 0x268   :  { %v1804_v63 = vadd.f32 %v2310_v11, %v2157_v46 }
 0x26a   :  { %v2311_v28 = vpop.f32.mrb[12].mxu1 }
 0x26b   :  { %v2312_v33 = vpop.f32.mrb[13].mxu1 }
 0x26c   :  { %v2313_v15 = vadd.f32 %v2312_v33, %v2311_v28  ;;  %v2314_v45 = vpop.f32.mrb[14].mxu1 }
 0x26d   :  { %v2315_v51 = vpop.f32.mrb[15].mxu1 }
 0x26e   :  { %v2316_v62 = vadd.f32 %v2315_v51, %v2314_v45  ;;  %v1809_v12 = vadd.f32 %v2313_v15, %v2157_v46 }
 0x270   :  { %v1812_v47 = vadd.f32 %v2316_v62, %v2157_v46 }
 0x272   :  { %v2317_v25 = vpop.f32.mrb[16].mxu1 }
 0x273   :  { %v2318_v38 = vpop.f32.mrb[17].mxu1 }
 0x274   :  { %v2319_v35 = vadd.f32 %v2318_v38, %v2317_v25  ;;  %v2320_v48 = vpop.f32.mrb[18].mxu1 }
 0x275   :  { %v2321_v49 = vpop.f32.mrb[19].mxu1 }
 0x276   :  { %v2322_v41 = vadd.f32 %v2321_v49, %v2320_v48  ;;  %v1817_v18 = vadd.f32 %v2319_v35, %v2157_v46 }
 0x278   :  { %v1820_v22 = vadd.f32 %v2322_v41, %v2157_v46 }
 0x282   :  { %v2339_v34 = vpop.f32.mrb[20].mxu1 }
 0x283   :  { %v2340_v52 = vpop.f32.mrb[21].mxu1 }
 0x284   :  { %v2341_v56 = vadd.f32 %v2340_v52, %v2339_v34  ;;  %v2342_v58 = vpop.f32.mrb[22].mxu1 }
 0x285   :  { %v2343_v59 = vpop.f32.mrb[23].mxu1 }
 0x286   :  { %v1858_v1 = vadd.f32 %v2341_v56, %v1801_v54  ;;  %v2344_v2 = vadd.f32 %v2343_v59, %v2342_v58 }
 0x288   :  { %v1886_v5 = vmul.f32 %v1858_v1, %v1858_v1  ;;  %v1861_v16 = vadd.f32 %v2344_v2, %v1804_v63  ;;  %v1880_v62 = vmul.f32 0.5, %v1858_v1 }
 0x28a   :  { %v1892_v3 = vmul.f32 0.044715, %v1886_v5  ;;  %v1887_v4 = vmul.f32 %v1861_v16, %v1861_v16  ;;  %v2345_v7 = vpop.f32.mrb[24].mxu1  ;;  %v1881_v41 = vmul.f32 0.5, %v1861_v16 }
 0x28b   :  { %v2346_v10 = vpop.f32.mrb[25].mxu1 }
 0x28c   :  { %v1898_v20 = vmul.f32 %v1892_v3, %v1858_v1  ;;  %v1893_v29 = vmul.f32 0.044715, %v1887_v4  ;;  %v2347_v55 = vadd.f32 %v2346_v10, %v2345_v7  ;;  %v2348_v17 = vpop.f32.mrb[26].mxu1 }
 0x28d   :  { %v2349_v19 = vpop.f32.mrb[27].mxu1 }
 0x28e   :  { %v1904_v21 = vadd.f32 %v1898_v20, %v1858_v1  ;;  %v1899_v23 = vmul.f32 %v1893_v29, %v1861_v16  ;;  %v1866_v32 = vadd.f32 %v2347_v55, %v1809_v12  ;;  %v2350_v37 = vadd.f32 %v2349_v19, %v2348_v17 }
 0x290   :  { %v1910_v53 = vmul.f32 0.7978846, %v1904_v21  ;;  %v1905_v27 = vadd.f32 %v1899_v23, %v1861_v16  ;;  %v1888_v57 = vmul.f32 %v1866_v32, %v1866_v32  ;;  %v1869_v30 = vadd.f32 %v2350_v37, %v1812_v47 }
 0x291   :  { %v1882_v59 = vmul.f32 0.5, %v1866_v32 }
 0x292   :  { %2732 = vtanh.f32 %v1910_v53  ;;  %v1911_v60 = vmul.f32 0.7978846, %v1905_v27  ;;  %v1894_v61 = vmul.f32 0.044715, %v1888_v57  ;;  %v2351_v8 = vpop.f32.mrb[28].mxu1  ;;  %v1889_v9 = vmul.f32 %v1869_v30, %v1869_v30 }
 0x293   :  { %v2352_v13 = vpop.f32.mrb[29].mxu1  ;;  %v1883_v5 = vmul.f32 0.5, %v1869_v30 }
 0x294   :  { %2734 = vtanh.f32 %v1911_v60  ;;  %v1900_v31 = vmul.f32 %v1894_v61, %v1866_v32  ;;  %v2353_v36 = vadd.f32 %v2352_v13, %v2351_v8  ;;  %v2354_v50 = vpop.f32.mrb[30].mxu1  ;;  %v1895_v0 = vmul.f32 0.044715, %v1889_v9 }
 0x295   :  { %v2355_v14 = vpop.f32.mrb[31].mxu1 }
 0x296   :  { %v1906_v39 = vadd.f32 %v1900_v31, %v1866_v32  ;;  %v1874_v40 = vadd.f32 %v2353_v36, %v1817_v18  ;;  %v2356_v24 = vadd.f32 %v2355_v14, %v2354_v50  ;;  %v1901_v42 = vmul.f32 %v1895_v0, %v1869_v30 }
 0x298   :  { %v1912_v6 = vmul.f32 0.7978846, %v1906_v39  ;;  %v1890_v26 = vmul.f32 %v1874_v40, %v1874_v40  ;;  %v1877_v43 = vadd.f32 %v2356_v24, %v1820_v22  ;;  %v1907_v44 = vadd.f32 %v1901_v42, %v1869_v30 }
 0x299   :  { %v1884_v7 = vmul.f32 0.5, %v1874_v40 }
 0x29a   :  { %2736 = vtanh.f32 %v1912_v6  ;;  %v1896_v11 = vmul.f32 0.044715, %v1890_v26  ;;  %v1891_v28 = vmul.f32 %v1877_v43, %v1877_v43  ;;  %v1913_v33 = vmul.f32 0.7978846, %v1907_v44 }
 0x29b   :  { %v1885_v29 = vmul.f32 0.5, %v1877_v43 }
 0x29c   :  { %v2733_v15 = vpop.eup %2732  ;;  %v1902_v45 = vmul.f32 %v1896_v11, %v1874_v40  ;;  %v1897_v51 = vmul.f32 0.044715, %v1891_v28  ;;  %2738 = vtanh.f32 %v1913_v33 }
 0x29d   :  { %v1922_v25 = vadd.f32 1.0, %v2733_v15 }
 0x29e   :  { %v2735_v38 = vpop.eup %2734  ;;  %v1908_v35 = vadd.f32 %v1902_v45, %v1874_v40  ;;  %v1903_v48 = vmul.f32 %v1897_v51, %v1877_v43 }
 0x29f   :  { %v1928_v49 = vmul.f32 %v1922_v25, %v1880_v62  ;;  %v1923_v46 = vadd.f32 1.0, %v2735_v38 }
 0x2a0   :  { %v1914_v34 = vmul.f32 0.7978846, %v1908_v35  ;;  %v1909_v52 = vadd.f32 %v1903_v48, %v1877_v43 }
 0x2a1   :  { %1934 = vst [vmem:[%s3455_s5] sm:$0xff] %v1928_v49  ;;  %v1929_v54 = vmul.f32 %v1923_v46, %v1881_v41 }
 0x2a2   :  { %2740 = vtanh.f32 %v1914_v34  ;;  %v1915_v56 = vmul.f32 0.7978846, %v1909_v52 }
 0x2a3   :  { %1935 = vst [vmem:[%s3455_s5 + $0x8] sm:$0xff] %v1929_v54 }
 0x2a4   :  { %v2737_v58 = vpop.eup %2736  ;;  %2742 = vtanh.f32 %v1915_v56 }
 0x2a5   :  { %v1924_v63 = vadd.f32 1.0, %v2737_v58 }
 0x2a6   :  { %v2739_v1 = vpop.eup %2738 }
 0x2a7   :  { %v1930_v2 = vmul.f32 %v1924_v63, %v1882_v59  ;;  %v1925_v16 = vadd.f32 1.0, %v2739_v1 }
 0x2a9   :  { %1936 = vst [vmem:[%s3455_s5 + $0x10] sm:$0xff] %v1930_v2  ;;  %v1931_v3 = vmul.f32 %v1925_v16, %v1883_v5 }
 0x2ab   :  { %1937 = vst [vmem:[%s3455_s5 + $0x18] sm:$0xff] %v1931_v3 }
 0x2ac   :  { %v2741_v4 = vpop.eup %2740 }
 0x2ad   :  { %v1926_v10 = vadd.f32 1.0, %v2741_v4 }
 0x2ae   :  { %v2743_v12 = vpop.eup %2742 }
 0x2af   :  { %v1932_v20 = vmul.f32 %v1926_v10, %v1884_v7  ;;  %v1927_v55 = vadd.f32 1.0, %v2743_v12 }
 0x2b1   :  { %1938 = vst [vmem:[%s3455_s5 + $0x20] sm:$0xff] %v1932_v20  ;;  %v1933_v17 = vmul.f32 %v1927_v55, %v1885_v29 }
 0x2b3   :  { %1939 = vst [vmem:[%s3455_s5 + $0x28] sm:$0xff] %v1933_v17 }

</bundles_post_ra>
